<compile_context>
chip_gen: v5e
topology: v5e:2x2
jax: 0.10.0
libtpu: 0.0.40
codegen_flags: <defaults>
</compile_context>

<pallas_src>
import functools

import jax
import jax.numpy as jnp
from jax.experimental import pallas as pl
from jax.experimental.pallas import tpu as pltpu

EPS_BN = 1e-5    # nn.BatchNorm1d default eps
EPS_L2 = 1e-12   # F.normalize default eps


def _head_kernel(x_ref, a_ref, b_ref, w_ref, bias_ref, o_ref, acc_ref,
                 *, inv_hw):
    """x_ref: (b_tile, C, hw_tile) feature-map block (channels on sublanes,
    spatial on lanes).  acc_ref: (b_tile, C) f32 running spatial sum."""
    hw_idx = pl.program_id(1)

    @pl.when(hw_idx == 0)
    def _init():
        acc_ref[...] = jnp.zeros_like(acc_ref)

    # Spatial pooling: accumulate the sum over the (lane) spatial axis in f32.
    acc_ref[...] += jnp.sum(x_ref[...].astype(jnp.float32), axis=-1)

    @pl.when(hw_idx == pl.num_programs(1) - 1)
    def _finalize():
        pooled = acc_ref[...] * inv_hw                     # (b_tile, C)

        # BatchNorm1d (eval), pre-folded into a per-channel affine a*x + b.
        bn = pooled * a_ref[...] + b_ref[...]

        # l2_norm along the feature dim (F.normalize p=2, eps=1e-12).
        sq = jnp.sum(bn * bn, axis=-1, keepdims=True)      # (b_tile, 1)
        inv_norm = 1.0 / jnp.maximum(jnp.sqrt(sq), EPS_L2)  # exact reciprocal
        normed = bn * inv_norm

        # Linear(emb_size, num_classes); `scale` already folded into w / bias.
        logits = jnp.dot(normed, w_ref[...],
                         preferred_element_type=jnp.float32) + bias_ref[...]
        o_ref[...] = logits.astype(o_ref.dtype)


def general_backbone_classifier_head(features_nchw, params, *, scale=1.0):
    """features_nchw: (B, C, H, W) backbone feature map (PyTorch layout),
    f32 or bf16."""
    B, C, H, W = features_nchw.shape
    HW = H * W
    # NCHW -> (B, C, HW): contiguous reshape only, no transpose / extra HBM pass.
    x = features_nchw.reshape(B, C, HW)

    # Fold BN (eval) into a per-channel affine and `scale` into the FC.
    a = (params["bn_gamma"].astype(jnp.float32)
         * jax.lax.rsqrt(params["bn_running_var"].astype(jnp.float32) + EPS_BN)
         ).reshape(1, C)
    b = (params["bn_beta"].astype(jnp.float32).reshape(1, C)
         - params["bn_running_mean"].astype(jnp.float32).reshape(1, C) * a)
    w_scaled = (params["fc_weight"].astype(jnp.float32).T * scale)   # (C, NC)
    bias_scaled = (params["fc_bias"].astype(jnp.float32) * scale).reshape(1, -1)
    NC = w_scaled.shape[1]

    # --- tiling -------------------------------------------------------------
    # Batch tile: 8 rows when possible (keeps double-buffered blocks small
    # enough for v5e's 16 MiB / v7x's 32 MiB scoped VMEM defaults); the out
    # block's second-to-last dim must be a multiple of 8 or the full batch.
    b_tile = 8 if (B % 8 == 0) else B
    # Spatial tile: chunk HW into 128-multiples if it divides evenly, else use
    # the full spatial extent (legal since it equals the array dim, e.g. HW=49).
    hw_tile = HW
    for cand in (2048, 1024, 512, 256, 128):
        if HW % cand == 0:
            hw_tile = cand
            break

    grid = (B // b_tile, HW // hw_tile)   # reduction (spatial) axis last

    kernel = functools.partial(_head_kernel, inv_hw=1.0 / HW)

    grid_spec = pltpu.PrefetchScalarGridSpec(
        num_scalar_prefetch=0,
        grid=grid,
        in_specs=[
            pl.BlockSpec((b_tile, C, hw_tile), lambda bi, hi: (bi, 0, hi)),
            pl.BlockSpec((1, C), lambda bi, hi: (0, 0)),      # BN affine a
            pl.BlockSpec((1, C), lambda bi, hi: (0, 0)),      # BN affine b
            pl.BlockSpec((C, NC), lambda bi, hi: (0, 0)),     # fc weight * scale
            pl.BlockSpec((1, NC), lambda bi, hi: (0, 0)),     # fc bias * scale
        ],
        out_specs=pl.BlockSpec((b_tile, NC), lambda bi, hi: (bi, 0)),
        scratch_shapes=[pltpu.VMEM((b_tile, C), jnp.float32)],
    )

    return pl.pallas_call(
        kernel,
        out_shape=jax.ShapeDtypeStruct((B, NC), jnp.float32),
        grid_spec=grid_spec,
        compiler_params=pltpu.CompilerParams(
            dimension_semantics=("parallel", "arbitrary")),
    )(x, a, b, w_scaled, bias_scaled)


def reference_head(features_nchw, params, *, scale=1.0):
    """Pure-JAX reference mirroring the PyTorch forward (eval mode)."""
    pooled = jnp.mean(features_nchw.astype(jnp.float32), axis=(2, 3))  # (B, C)
    bn = ((pooled - params["bn_running_mean"])
          * jax.lax.rsqrt(params["bn_running_var"] + EPS_BN)
          * params["bn_gamma"] + params["bn_beta"])
    norm = jnp.sqrt(jnp.sum(bn * bn, axis=1, keepdims=True))
    normed = bn / jnp.maximum(norm, EPS_L2)
    return (normed @ params["fc_weight"].T + params["fc_bias"]) * scale


def make_params(C, num_classes):
    """Deterministic parameter init (synthetic, no checkpoint)."""
    c_idx = jnp.arange(C, dtype=jnp.float32)
    return {
        # BatchNorm1d: weight init 1, bias init 0 (and frozen); non-trivial
        # running stats so the BN path is exercised.
        "bn_gamma": 1.0 + 0.01 * jnp.sin(c_idx),
        "bn_beta": jnp.zeros((C,), jnp.float32),
        "bn_running_mean": 0.05 * jnp.cos(c_idx),
        "bn_running_var": 1.0 + 0.02 * jnp.sin(0.5 * c_idx),
        # Linear(emb_size=C, num_classes): weight (NC, C), bias (NC,)
        "fc_weight": (0.02 * jnp.sin(
            jnp.arange(num_classes * C, dtype=jnp.float32)
        )).reshape(num_classes, C),
        "fc_bias": 0.01 * jnp.arange(num_classes, dtype=jnp.float32),
    }


if __name__ == "__main__":
    key = jax.random.PRNGKey(0)
    k1, k2 = jax.random.split(key)

    # Case 1: tiny shapes, single tile (grid = (1, 1)).
    B, C, H, W = 2, 64, 8, 8
    NC, SCALE = 4, 1.0
    feats = jax.random.normal(k1, (B, C, H, W), dtype=jnp.float32)
    params = make_params(C, NC)
    out = jax.block_until_ready(
        general_backbone_classifier_head(feats, params, scale=SCALE))
    ref = reference_head(feats, params, scale=SCALE)
    assert out.shape == (B, NC)
    assert jnp.allclose(out, ref, atol=1e-5, rtol=1e-5), (out, ref)

    # Case 2: exercises the pipelined/tiled path: batch tiles (B=16 -> b_tile=8,
    # "parallel") and spatial reduction tiles (HW=256 -> hw_tile=128,
    # "arbitrary" with pl.when init / finalize on the VMEM accumulator).
    B2, C2, H2, W2, NC2, SCALE2 = 16, 256, 16, 16, 4, 30.0
    feats2 = jax.random.normal(k2, (B2, C2, H2, W2), dtype=jnp.float32)
    params2 = make_params(C2, NC2)
    out2 = jax.block_until_ready(
        general_backbone_classifier_head(feats2, params2, scale=SCALE2))
    ref2 = reference_head(feats2, params2, scale=SCALE2)
    assert out2.shape == (B2, NC2)
    assert jnp.allclose(out2, ref2, atol=1e-4, rtol=1e-4), (out2, ref2)

    print("KERNEL_OK")
</pallas_src>

<mosaic_0001>
module attributes {stable_mosaic.version = 11 : i64} {
  func.func @_head_kernel(%arg0: i32, %arg1: i32, %arg2: memref<2x64x64xf32, #tpu.memory_space<vmem>>, %arg3: memref<1x64xf32, #tpu.memory_space<vmem>>, %arg4: memref<1x64xf32, #tpu.memory_space<vmem>>, %arg5: memref<64x4xf32, #tpu.memory_space<vmem>>, %arg6: memref<1x4xf32, #tpu.memory_space<vmem>>, %arg7: memref<2x4xf32, #tpu.memory_space<vmem>>, %arg8: memref<2x64xf32, #tpu.memory_space<vmem>>) attributes {dimension_semantics = [#tpu.dimension_semantics<parallel>, #tpu.dimension_semantics<arbitrary>], iteration_bounds = array<i64: 1, 1>, scalar_prefetch = 0 : i64, scratch_operands = 1 : i64, tpu.core_type = #tpu.core_type<tc>, window_params = [{transform_indices = @transform_0, window_bounds = array<i64: 2, 64, 64>}, {pipeline_mode = #tpu.pipeline_mode<synchronous>, transform_indices = @transform_1, window_bounds = array<i64: 1, 64>}, {pipeline_mode = #tpu.pipeline_mode<synchronous>, transform_indices = @transform_2, window_bounds = array<i64: 1, 64>}, {pipeline_mode = #tpu.pipeline_mode<synchronous>, transform_indices = @transform_3, window_bounds = array<i64: 64, 4>}, {pipeline_mode = #tpu.pipeline_mode<synchronous>, transform_indices = @transform_4, window_bounds = array<i64: 1, 4>}, {transform_indices = @transform_5, window_bounds = array<i64: 2, 4>}]} {
    %c0_i32 = arith.constant 0 : i32
    %0 = arith.cmpi eq, %arg1, %c0_i32 : i32
    %1 = arith.extui %0 : i1 to i32
    %c0_i32_0 = arith.constant 0 : i32
    %2 = arith.cmpi ne, %1, %c0_i32_0 : i32
    scf.if %2 {
      %cst_9 = arith.constant 0.000000e+00 : f32
      %11 = vector.broadcast %cst_9 : f32 to vector<2x64xf32>
      %c0_10 = arith.constant 0 : index
      %c0_11 = arith.constant 0 : index
      %12 = vector.load %arg8[%c0_10, %c0_11] : memref<2x64xf32, #tpu.memory_space<vmem>>, vector<2x64xf32>
      tpu.vector_store %arg8[%c0_10, %c0_11], %11 {strides = array<i32>} : memref<2x64xf32, #tpu.memory_space<vmem>>, vector<2x64xf32>,
    } else {
    }
    %c0 = arith.constant 0 : index
    %c0_1 = arith.constant 0 : index
    %3 = vector.load %arg8[%c0, %c0_1] : memref<2x64xf32, #tpu.memory_space<vmem>>, vector<2x64xf32>
    %c0_2 = arith.constant 0 : index
    %c0_3 = arith.constant 0 : index
    %c0_4 = arith.constant 0 : index
    %4 = vector.load %arg2[%c0_2, %c0_3, %c0_4] : memref<2x64x64xf32, #tpu.memory_space<vmem>>, vector<2x64x64xf32>
    %cst = arith.constant dense<0.000000e+00> : vector<2x64xf32>
    %5 = vector.multi_reduction <add>, %4, %cst [2] : vector<2x64x64xf32> to vector<2x64xf32>
    %6 = arith.addf %3, %5 : vector<2x64xf32>
    %c0_5 = arith.constant 0 : index
    %c0_6 = arith.constant 0 : index
    %7 = vector.load %arg8[%c0_5, %c0_6] : memref<2x64xf32, #tpu.memory_space<vmem>>, vector<2x64xf32>
    tpu.vector_store %arg8[%c0_5, %c0_6], %6 {strides = array<i32>} : memref<2x64xf32, #tpu.memory_space<vmem>>, vector<2x64xf32>,
    %c0_i32_7 = arith.constant 0 : i32
    %8 = arith.cmpi eq, %arg1, %c0_i32_7 : i32
    %9 = arith.extui %8 : i1 to i32
    %c0_i32_8 = arith.constant 0 : i32
    %10 = arith.cmpi ne, %9, %c0_i32_8 : i32
    scf.if %10 {
      %c0_9 = arith.constant 0 : index
      %c0_10 = arith.constant 0 : index
      %11 = vector.load %arg8[%c0_9, %c0_10] : memref<2x64xf32, #tpu.memory_space<vmem>>, vector<2x64xf32>
      %cst_11 = arith.constant 1.562500e-02 : f32
      %12 = vector.broadcast %cst_11 : f32 to vector<2x64xf32>
      %13 = arith.mulf %11, %12 : vector<2x64xf32>
      %c0_12 = arith.constant 0 : index
      %c0_13 = arith.constant 0 : index
      %14 = vector.load %arg3[%c0_12, %c0_13] : memref<1x64xf32, #tpu.memory_space<vmem>>, vector<1x64xf32>
      %15 = vector.broadcast %14 : vector<1x64xf32> to vector<2x64xf32>
      %16 = arith.mulf %13, %15 : vector<2x64xf32>
      %c0_14 = arith.constant 0 : index
      %c0_15 = arith.constant 0 : index
      %17 = vector.load %arg4[%c0_14, %c0_15] : memref<1x64xf32, #tpu.memory_space<vmem>>, vector<1x64xf32>
      %18 = vector.broadcast %17 : vector<1x64xf32> to vector<2x64xf32>
      %19 = arith.addf %16, %18 : vector<2x64xf32>
      %20 = arith.mulf %19, %19 : vector<2x64xf32>
      %cst_16 = arith.constant dense<0.000000e+00> : vector<2xf32>
      %21 = vector.multi_reduction <add>, %20, %cst_16 [1] : vector<2x64xf32> to vector<2xf32>
      %22 = vector.shape_cast %21 : vector<2xf32> to vector<2x1xf32>
      %23 = math.sqrt %22 : vector<2x1xf32>
      %cst_17 = arith.constant 9.99999996E-13 : f32
      %24 = vector.broadcast %cst_17 : f32 to vector<2x1xf32>
      %25 = arith.maximumf %23, %24 : vector<2x1xf32>
      %cst_18 = arith.constant 1.000000e+00 : f32
      %26 = vector.broadcast %cst_18 : f32 to vector<2x1xf32>
      %27 = arith.divf %26, %25 : vector<2x1xf32>
      %28 = vector.broadcast %27 : vector<2x1xf32> to vector<2x64xf32>
      %29 = arith.mulf %19, %28 : vector<2x64xf32>
      %c0_19 = arith.constant 0 : index
      %c0_20 = arith.constant 0 : index
      %30 = vector.load %arg5[%c0_19, %c0_20] : memref<64x4xf32, #tpu.memory_space<vmem>>, vector<64x4xf32>
      %cst_21 = arith.constant dense<0.000000e+00> : vector<2x4xf32>
      %31 = tpu.matmul %29, %30, %cst_21 {dimension_numbers = #tpu.dot_dimension_numbers<[1], [0], [0], [1], [0, 0, 1, 1], [], []>} : vector<2x64xf32>, vector<64x4xf32>, vector<2x4xf32> -> vector<2x4xf32>
      %c0_22 = arith.constant 0 : index
      %c0_23 = arith.constant 0 : index
      %32 = vector.load %arg6[%c0_22, %c0_23] : memref<1x4xf32, #tpu.memory_space<vmem>>, vector<1x4xf32>
      %33 = vector.broadcast %32 : vector<1x4xf32> to vector<2x4xf32>
      %34 = arith.addf %31, %33 : vector<2x4xf32>
      %c0_24 = arith.constant 0 : index
      %c0_25 = arith.constant 0 : index
      %35 = vector.load %arg7[%c0_24, %c0_25] : memref<2x4xf32, #tpu.memory_space<vmem>>, vector<2x4xf32>
      tpu.vector_store %arg7[%c0_24, %c0_25], %34 {strides = array<i32>} : memref<2x4xf32, #tpu.memory_space<vmem>>, vector<2x4xf32>,
    } else {
    }
    return
  }
  func.func @transform_0(%arg0: i32, %arg1: i32) -> (i32, i32, i32) {
    %c0_i32 = arith.constant 0 : i32
    %c0_i32_0 = arith.constant 0 : i32
    return %arg0, %c0_i32, %arg1 : i32, i32, i32
  }
  func.func @transform_1(%arg0: i32, %arg1: i32) -> (i32, i32) {
    %c0_i32 = arith.constant 0 : i32
    %c0_i32_0 = arith.constant 0 : i32
    %c0_i32_1 = arith.constant 0 : i32
    return %c0_i32, %c0_i32_0 : i32, i32
  }
  func.func @transform_2(%arg0: i32, %arg1: i32) -> (i32, i32) {
    %c0_i32 = arith.constant 0 : i32
    %c0_i32_0 = arith.constant 0 : i32
    %c0_i32_1 = arith.constant 0 : i32
    return %c0_i32, %c0_i32_0 : i32, i32
  }
  func.func @transform_3(%arg0: i32, %arg1: i32) -> (i32, i32) {
    %c0_i32 = arith.constant 0 : i32
    %c0_i32_0 = arith.constant 0 : i32
    %c0_i32_1 = arith.constant 0 : i32
    return %c0_i32, %c0_i32_0 : i32, i32
  }
  func.func @transform_4(%arg0: i32, %arg1: i32) -> (i32, i32) {
    %c0_i32 = arith.constant 0 : i32
    %c0_i32_0 = arith.constant 0 : i32
    %c0_i32_1 = arith.constant 0 : i32
    return %c0_i32, %c0_i32_0 : i32, i32
  }
  func.func @transform_5(%arg0: i32, %arg1: i32) -> (i32, i32) {
    %c0_i32 = arith.constant 0 : i32
    %c0_i32_0 = arith.constant 0 : i32
    return %arg0, %c0_i32 : i32, i32
  }
}

</mosaic_0001>

<bundles_post_ra>
// kernel: tpu_custom_call.1
= control target key start
LH: loop header
LB: loop body
LE: loop exit
PB: predicated region body
PF: predicated region fallthrough
CT: control target
= control target key end

     0   :  { %10 = vsyncpa [#allocation4], 0  ;;  %s442_s0 = inlined_call_operand.hbm [shape: f32[2,64,64], index: 0, kind: input, shape index: {}]   ;;  %s443_s1 = inlined_call_operand.vmem [shape: f32[1,64], index: 1, kind: input, shape index: {}]   ;;  %s444_s2 = inlined_call_operand.vmem [shape: f32[1,64], index: 2, kind: input, shape index: {}]   ;;  %s445_s3 = inlined_call_operand.vmem [shape: f32[64,4], index: 3, kind: input, shape index: {}]   ;;  %s446_s4 = inlined_call_operand.vmem [shape: f32[1,4], index: 4, kind: input, shape index: {}]   ;;  %s447_s5 = inlined_call_operand.hbm [shape: f32[2,4], index: 5, kind: output, shape index: {}]  }
   0x1   :  { %11 = vsyncpa [#allocation5], 0  ;;  %s16_s20 = sshll.u32 %s442_s0, 4  ;;  %s344_s21 = smov [#allocation3]   ;;  %s17_s20 = int_to_ptr.hbm [resolvable:$true] %s16_s20 }
   0x2   :  { %s18_s22 = sshll.u32 %s344_s21, 4  ;;  %s345_s23 = smov 128   ;;  %s19_s22 = int_to_ptr.vmem [resolvable:$true] %s18_s22 }
   0x3   :  { %s346_s24 = smov 8  }
   0x4   :  { %24 = dma.hbm_to_vmem [thread:$0]  %s17_s20, 2048, %s19_s22, [#allocation4], %s345_s23, %s345_s23, %s346_s24  }
   0x5   :  { %340 = dma.done.wait [#allocation4], 2048  }
   0x6   :  { %341 = vsyncadd [#allocation4], 4294965248  ;;  %vm60_vm0 = vcmask 523264   ;;  %v52_v0 = vld [vmem:[#allocation3 + $0x40] sm:$0xff]  ;;  %v46_v2 = vld [vmem:[#allocation3 + $0x10] sm:$0xff]  ;;  %vm41_vm1 = vcmask 517120   ;;  %v125_v41 = vlaneseq }
   0x7   :  { %v44_v1 = vld [vmem:[#allocation3] sm:$0xff]  ;;  %v85_v3 = vsel %vm60_vm0, %v52_v0, 0.0  ;;  %v67_v5 = vsel %vm60_vm0, %v46_v2, 0.0  ;;  %v53_v6 = vld [vmem:[#allocation3 + $0x48] sm:$0xff]  ;;  %v54_v8 = vld [vmem:[#allocation3 + $0x50] sm:$0xff]  ;;  %v347_v35 = vmov 0.0  }
   0x8   :  { %v61_v4 = vsel %vm60_vm0, %v44_v1, 0.0  ;;  %86 = vadd.xlane.f32.xlu1 %v85_v3  ;;  %68 = vadd.xlane.f32.xlu2 %v67_v5  ;;  %v45_v7 = vld [vmem:[#allocation3 + $0x8] sm:$0xff]  ;;  %v88_v9 = vsel %vm60_vm0, %v53_v6, 0.0  ;;  %v91_v11 = vsel %vm60_vm0, %v54_v8, 0.0  ;;  %v55_v12 = vld [vmem:[#allocation3 + $0x58] sm:$0xff]  ;;  %v48_v14 = vld [vmem:[#allocation3 + $0x20] sm:$0xff] }
   0x9   :  { %62 = vadd.xlane.f32.xlu0 %v61_v4  ;;  %v64_v10 = vsel %vm60_vm0, %v45_v7, 0.0  ;;  %v47_v13 = vld [vmem:[#allocation3 + $0x18] sm:$0xff]  ;;  %v94_v15 = vsel %vm60_vm0, %v55_v12, 0.0  ;;  %v73_v17 = vsel %vm60_vm0, %v48_v14, 0.0  ;;  %v49_v18 = vld [vmem:[#allocation3 + $0x28] sm:$0xff]  ;;  %v56_v19 = vld [vmem:[#allocation3 + $0x60] sm:$0xff] }
   0xa   :  { %v70_v16 = vsel %vm60_vm0, %v47_v13, 0.0  ;;  %v57_v20 = vld [vmem:[#allocation3 + $0x68] sm:$0xff]  ;;  %v76_v21 = vsel %vm60_vm0, %v49_v18, 0.0  ;;  %v97_v22 = vsel %vm60_vm0, %v56_v19, 0.0  ;;  %v58_v24 = vld [vmem:[#allocation3 + $0x70] sm:$0xff]  ;;  %v51_v26 = vld [vmem:[#allocation3 + $0x38] sm:$0xff] }
   0xb   :  { %v100_v23 = vsel %vm60_vm0, %v57_v20, 0.0  ;;  %v50_v25 = vld [vmem:[#allocation3 + $0x30] sm:$0xff]  ;;  %v103_v27 = vsel %vm60_vm0, %v58_v24, 0.0  ;;  %v82_v29 = vsel %vm60_vm0, %v51_v26, 0.0  ;;  %v59_v30 = vld [vmem:[#allocation3 + $0x78] sm:$0xff]  ;;  %v126_v43 = vand.u32 127, %v125_v41 }
   0xc   :  { %v79_v28 = vsel %vm60_vm0, %v50_v25, 0.0  ;;  %v106_v31 = vsel %vm60_vm0, %v59_v30, 0.0  ;;  %42 = vst.msk [vmem:[#allocation2] sm:$0x3] %vm41_vm1, %v347_v35  ;;  %vm130_vm2 = vcmask 130112   ;;  %vm134_vm3 = vcmask 195712  }
   0xd   :  { %v128_v44 = vadd.s32 4294967288, %v126_v43  ;;  %v132_v47 = vadd.s32 4294967280, %v126_v43  ;;  %v136_v50 = vadd.s32 4294967272, %v126_v43  ;;  %v140_v55 = vadd.s32 4294967264, %v126_v43  ;;  %v286_v30 = vld [vmem:[%s444_s2] ss:$0 sm:$0xff] }
   0xe   :  { %v144_v58 = vadd.s32 4294967256, %v126_v43  ;;  %vm138_vm4 = vcmask 261312   ;;  %v148_v60 = vadd.s32 4294967248, %v126_v43  ;;  %vm142_vm5 = vcmask 326912   ;;  %v232_v35 = vld [vmem:[%s445_s3 + $0x38] sm:$0xff]  ;;  %v227_v41 = vld [vmem:[%s445_s3 + $0x10] sm:$0xff] }
   0xf   :  { %v152_v6 = vadd.s32 4294967240, %v126_v43  ;;  %vm146_vm6 = vcmask 392512   ;;  %vm150_vm7 = vcmask 458112   ;;  %vm154_vm8 = vcmask 523712   ;;  %248 = vmatpush.msra.mxu0 %v232_v35  ;;  %s348_s18 = smov [#allocation6]   ;;  %s269_s22 = sshll.u32 %s447_s5, 4  ;;  %s270_s22 = int_to_ptr.hbm [resolvable:$true] %s269_s22 }
  0x10   :  { %89 = vadd.xlane.f32.xlu1 %v88_v9  ;;  %92 = vadd.xlane.f32.xlu2 %v91_v11  ;;  %vm171_vm9 = vcmask 1041409   ;;  %s267_s19 = sshll.u32 %s348_s18, 4  ;;  %s268_s19 = int_to_ptr.vmem [resolvable:$true] %s267_s19 }
  0x11   :  { %65 = vadd.xlane.f32.xlu0 %v64_v10 }
  0x18   :  { %95 = vadd.xlane.f32.xlu1 %v94_v15  ;;  %74 = vadd.xlane.f32.xlu2 %v73_v17 }
  0x19   :  { %71 = vadd.xlane.f32.xlu0 %v70_v16 }
  0x20   :  { %77 = vadd.xlane.f32.xlu1 %v76_v21  ;;  %101 = vadd.xlane.f32.xlu2 %v100_v23 }
  0x21   :  { %98 = vadd.xlane.f32.xlu0 %v97_v22  ;;  %v43_v22 = vld [vmem:[#allocation2] sm:$0x3] }
  0x28   :  { %104 = vadd.xlane.f32.xlu1 %v103_v27  ;;  %83 = vadd.xlane.f32.xlu2 %v82_v29  ;;  %v285_v27 = vld [vmem:[%s443_s1] ss:$0 sm:$0xff] }
  0x29   :  { %80 = vadd.xlane.f32.xlu0 %v79_v28 }
  0x31   :  { %107 = vadd.xlane.f32.xlu0 %v106_v31 }
  0x7b   :  { %v87_v32 = vpop.xlane.xlu1 %86  ;;  %v69_v34 = vpop.xlane.xlu2 %68 }
  0x7c   :  { %v63_v33 = vpop.xlane.xlu0 %62  ;;  %v156_v51 = vperm.slane %v87_v32, %v126_v43  ;;  %v133_v54 = vperm.slane %v69_v34, %v132_v47 }
  0x7d   :  { %v127_v52 = vperm.slane %v63_v33, %v126_v43  ;;  %v225_v43 = vld [vmem:[%s445_s3] sm:$0xff] }
  0x83   :  { %v90_v36 = vpop.xlane.xlu1 %89  ;;  %v93_v38 = vpop.xlane.xlu2 %92 }
  0x84   :  { %v66_v37 = vpop.xlane.xlu0 %65  ;;  %v157_v53 = vperm.slane %v90_v36, %v128_v44  ;;  %v159_v59 = vperm.slane %v93_v38, %v132_v47  ;;  %v231_v36 = vld [vmem:[%s445_s3 + $0x30] sm:$0xff]  ;;  %v229_v38 = vld [vmem:[%s445_s3 + $0x20] sm:$0xff] }
  0x85   :  { %v129_v49 = vperm.slane %v66_v37, %v128_v44  ;;  %v230_v37 = vld [vmem:[%s445_s3 + $0x28] sm:$0xff]  ;;  %249 = vmatpush.msra.mxu0 %v231_v36 }
  0x86   :  { %v158_v62 = vsel %vm130_vm2, %v157_v53, %v156_v51 }
  0x87   :  { %v131_v56 = vsel %vm130_vm2, %v129_v49, %v127_v52  ;;  %v160_v7 = vsel %vm134_vm3, %v159_v59, %v158_v62  ;;  %250 = vmatpush.msra.mxu0 %v230_v37 }
  0x88   :  { %v135_v0 = vsel %vm134_vm3, %v133_v54, %v131_v56 }
  0x89   :  { %251 = vmatpush.msra.mxu0 %v229_v38 }
  0x8b   :  { %v96_v39 = vpop.xlane.xlu1 %95  ;;  %v75_v42 = vpop.xlane.xlu2 %74 }
  0x8c   :  { %v72_v40 = vpop.xlane.xlu0 %71  ;;  %v161_v63 = vperm.slane %v96_v39, %v136_v50  ;;  %v141_v1 = vperm.slane %v75_v42, %v140_v55  ;;  %v228_v39 = vld [vmem:[%s445_s3 + $0x18] sm:$0xff]  ;;  %v226_v42 = vld [vmem:[%s445_s3 + $0x8] sm:$0xff] }
  0x8d   :  { %v137_v57 = vperm.slane %v72_v40, %v136_v50  ;;  %252 = vmatpush.msra.mxu0 %v228_v39 }
  0x8e   :  { %v162_v10 = vsel %vm138_vm4, %v161_v63, %v160_v7 }
  0x8f   :  { %v139_v3 = vsel %vm138_vm4, %v137_v57, %v135_v0  ;;  %253 = vmatpush.msra.mxu0 %v227_v41 }
  0x90   :  { %v143_v12 = vsel %vm142_vm5, %v141_v1, %v139_v3 }
  0x91   :  { %254 = vmatpush.msra.mxu0 %v226_v42 }
  0x93   :  { %v78_v46 = vpop.xlane.xlu1 %77  ;;  %v102_v48 = vpop.xlane.xlu2 %101  ;;  %255 = vmatpush.msra.mxu0 %v225_v43 }
  0x94   :  { %v99_v45 = vpop.xlane.xlu0 %98  ;;  %v145_v4 = vperm.slane %v78_v46, %v144_v58  ;;  %v165_v11 = vperm.slane %v102_v48, %v144_v58 }
  0x95   :  { %v163_v2 = vperm.slane %v99_v45, %v140_v55 }
  0x96   :  { %v147_v15 = vsel %vm146_vm6, %v145_v4, %v143_v12 }
  0x97   :  { %v164_v13 = vsel %vm142_vm5, %v163_v2, %v162_v10  ;;  %v287_v2 = vld [vmem:[%s446_s4] ss:$0 sm:$0xff] }
  0x98   :  { %v166_v19 = vsel %vm146_vm6, %v165_v11, %v164_v13 }
  0x9b   :  { %v105_v5 = vpop.xlane.xlu1 %104  ;;  %v84_v9 = vpop.xlane.xlu2 %83 }
  0x9c   :  { %v81_v61 = vpop.xlane.xlu0 %80  ;;  %v167_v14 = vperm.slane %v105_v5, %v148_v60  ;;  %v153_v16 = vperm.slane %v84_v9, %v152_v6 }
  0x9d   :  { %v149_v8 = vperm.slane %v81_v61, %v148_v60 }
  0x9e   :  { %v168_v21 = vsel %vm150_vm7, %v167_v14, %v166_v19 }
  0x9f   :  { %v151_v17 = vsel %vm150_vm7, %v149_v8, %v147_v15 }
  0xa0   :  { %v155_v23 = vsel %vm154_vm8, %v153_v16, %v151_v17 }
  0xa4   :  { %v108_v18 = vpop.xlane.xlu0 %107 }
  0xa5   :  { %v169_v20 = vperm.slane %v108_v18, %v152_v6 }
  0xa7   :  { %v170_v24 = vsel %vm154_vm8, %v169_v20, %v168_v21 }
  0xa8   :  { %v172_v25 = vsel %vm171_vm9, %v170_v24, %v155_v23 }
  0xa9   :  { %v174_v26 = vadd.f32 %v172_v25, %v43_v22 }
  0xab   :  { %176 = vst.msk [vmem:[#allocation2] sm:$0x3] %vm41_vm1, %v174_v26 }
  0xb2   :  { %v180_v28 = vld [vmem:[#allocation2] sm:$0x3] }
  0xb3   :  { %v181_v29 = vmul.f32 0.015625, %v180_v28 }
  0xb5   :  { %v186_v31 = vmul.f32 %v285_v27, %v181_v29 }
  0xb7   :  { %v191_v32 = vadd.f32 %v286_v30, %v186_v31 }
  0xb9   :  { %v192_v33 = vmul.f32 %v191_v32, %v191_v32 }
  0xbb   :  { %v193_v34 = vsel %vm41_vm1, %v192_v33, 0.0  ;;  %vm260_vm1 = vcmask 25600  }
  0xbc   :  { %194 = vadd.xlane.f32.xlu1 %v193_v34 }
 0x12f   :  { %v195_v40 = vpop.xlane.xlu1 %194 }
 0x130   :  { %288 = vrsqrt.f32 %v195_v40  ;;  %vm203_vm10 = vcmp.eq.f32.partialorder %v195_v40, inf  ;;  %v206_v51 = vand.u32 2147483648, %v195_v40  ;;  %vm205_vm11 = vcmp.eq.f32.partialorder %v195_v40, 0.0 }
 0x136   :  { %v289_v44 = vpop.eup %288 }
 0x137   :  { %v197_v45 = vmul.f32 %v289_v44, %v195_v40 }
 0x139   :  { %v198_v46 = vmul.f32 %v289_v44, %v197_v45 }
 0x13b   :  { %v199_v47 = vmul.f32 0.5, %v198_v46 }
 0x13d   :  { %v200_v48 = vsub.f32 1.5, %v199_v47 }
 0x13f   :  { %v201_v49 = vmul.f32 %v289_v44, %v200_v48 }
 0x141   :  { %v202_v50 = vmul.f32 %v201_v49, %v195_v40 }
 0x143   :  { %v204_v52 = vsel %vm203_vm10, %v195_v40, %v202_v50 }
 0x144   :  { %v207_v53 = vsel %vm205_vm11, %v206_v51, %v204_v52 }
 0x145   :  { %v208_v54 = vmax.f32 %v207_v53, 1e-12 }
 0x147   :  { %290 = vrcp.f32 %v208_v54  ;;  %v220_v58 = vand.u32 2147483648, %v208_v54  ;;  %v218_v60 = vand.u32 2147483647, %v208_v54  ;;  %vm214_vm13 = vweird.f32 %v208_v54 }
 0x149   :  { %v221_v62 = vor.u32 1.1754944e-38, %v220_v58  ;;  %vm219_vm15 = vcmp.eq.f32.partialorder %v218_v60, 8.507059e+37 }
 0x14d   :  { %v291_v55 = vpop.eup %290 }
 0x14e   :  { %v210_v56 = vmul.f32 %v291_v55, %v208_v54  ;;  %vm215_vm12 = vweird.f32 %v291_v55 }
 0x14f   :  { %vm216_vm14 = vmor %vm214_vm13, %vm215_vm12 }
 0x150   :  { %v211_v57 = vsub.f32 1.0, %v210_v56 }
 0x152   :  { %v212_v59 = vmul.f32 %v291_v55, %v211_v57 }
 0x154   :  { %v213_v61 = vadd.f32 %v291_v55, %v212_v59 }
 0x156   :  { %v217_v63 = vsel %vm216_vm14, %v291_v55, %v213_v61 }
 0x157   :  { %v222_v0 = vsel %vm219_vm15, %v221_v62, %v217_v63 }
 0x158   :  { %v224_v1 = vmul.f32 %v222_v0, %v191_v32 }
 0x15a   :  { %279 = vmatmul.msk.f32.vlgmr.msra.gmra.mxu0 %vm60_vm0, %v224_v1 }
 0x1d7   :  { %v257_v3 = vpop.f32.mrf.mxu0 }
 0x1d8   :  { %v258_v4 = vadd.f32 %v287_v2, %v257_v3 }
 0x1da   :  { %261 = vst.msk [vmem:[#allocation6] sm:$0x3] %vm260_vm1, %v258_v4 }
 0x1db   :  { %272 = dma.vmem_to_hbm [thread:$0]  %s268_s19, 32, %s270_s22, [#allocation5]  }
 0x1dc   :  { %342 = dma.done.wait [#allocation5], 32  }
 0x1dd   :  { %343 = vsyncadd [#allocation5], 4294967264 }
 0x1de   :  { %277 = vsyncpa [#allocation4], 1 }
 0x1df   :  { %278 = vsyncpa [#allocation5], 1 }

</bundles_post_ra>
